<compile_context>
chip_gen: v6e
topology: v6e:2x2x1
jax: 0.10.0
libtpu: 0.0.40
codegen_flags: <defaults>
</compile_context>

<pallas_src>
import jax
import jax.numpy as jnp
from jax.experimental import pallas as pl
from jax.experimental.pallas import tpu as pltpu

IN_FEATURES = 32 * 32 * 3   # K = 3072
OUT_FEATURES = 100          # logical N
N_PAD = 128                 # lane-dense padded N


def _linear_kernel(x_ref, w_ref, b_ref, o_ref):
    """One batch tile: o = x @ W_t + b. x cast to bf16 in-kernel, f32 accum."""
    x_bf = x_ref[...].astype(jnp.bfloat16)   # in-kernel cast: no extra HBM pass
    acc = jnp.dot(x_bf, w_ref[...], preferred_element_type=jnp.float32)
    o_ref[...] = (acc + b_ref[...]).astype(o_ref.dtype)


def prepare_params(w, b, *, weight_dtype=jnp.bfloat16):
    """One-time prep: PyTorch (100,3072)/(100,) -> lane-dense (3072,128)/(1,128)."""
    w_t = jnp.zeros((IN_FEATURES, N_PAD), weight_dtype)
    w_t = w_t.at[:, :OUT_FEATURES].set(w.T.astype(weight_dtype))
    b_pad = jnp.zeros((1, N_PAD), jnp.float32)
    b_pad = b_pad.at[0, :OUT_FEATURES].set(b.astype(jnp.float32))
    return w_t, b_pad


def _batch_tile(B, tb):
    """Pick batch tile: multiple of 8, >=2 grid steps when B > 8 (v7x 2-TC)."""
    if B <= 8:
        return B                      # single block == full batch dim (allowed)
    half = -(-B // 2)                 # ceil(B/2)
    half = -(-half // 8) * 8          # round up to sublane multiple
    return min(tb, half)


def logistic_regression_forward(x, w_padded, b_padded, *, tb=512):
    """x: (B,3,32,32) or (B,3072) f32; w_padded/b_padded from prepare_params().

    Returns (B, 100) logits, matching nn.Linear(3072, 100) forward.
    """
    x_flat = x.reshape(-1, IN_FEATURES)       # matches torch x.view(-1, 3072)
    B = x_flat.shape[0]
    K = IN_FEATURES
    out_dtype = x_flat.dtype

    tb_eff = _batch_tile(B, tb)
    grid = (pl.cdiv(B, tb_eff),)              # partial last block masked by Pallas

    cost = pl.CostEstimate(
        flops=2 * B * K * N_PAD,
        transcendentals=0,
        bytes_accessed=(x_flat.size * x_flat.dtype.itemsize
                        + w_padded.size * w_padded.dtype.itemsize
                        + b_padded.size * 4
                        + B * N_PAD * jnp.dtype(out_dtype).itemsize),
    )

    out = pl.pallas_call(
        _linear_kernel,
        out_shape=jax.ShapeDtypeStruct((B, N_PAD), out_dtype),
        grid_spec=pltpu.PrefetchScalarGridSpec(
            num_scalar_prefetch=0,
            grid=grid,
            in_specs=[
                pl.BlockSpec((tb_eff, K), lambda i: (i, 0)),   # x batch tile (f32)
                pl.BlockSpec((K, N_PAD), lambda i: (0, 0)),    # resident bf16 weights
                pl.BlockSpec((1, N_PAD), lambda i: (0, 0)),    # bias row (f32)
            ],
            out_specs=pl.BlockSpec((tb_eff, N_PAD), lambda i: (i, 0)),
        ),
        compiler_params=pltpu.CompilerParams(
            dimension_semantics=("parallel",),        # batch shards across TCs
            vmem_limit_bytes=48 * 1024 * 1024,        # fits v5e default / v7x 64 MiB
        ),
        cost_estimate=cost,
    )(x_flat, w_padded, b_padded)

    return out[:, :OUT_FEATURES]


def init_params(key):
    """Deterministic init mimicking nn.Linear: U(-1/sqrt(fan_in), 1/sqrt(fan_in))."""
    kw, kb = jax.random.split(key)
    bound = 1.0 / jnp.sqrt(jnp.float32(IN_FEATURES))
    w = jax.random.uniform(
        kw, (OUT_FEATURES, IN_FEATURES), jnp.float32, -bound, bound)
    b = jax.random.uniform(kb, (OUT_FEATURES,), jnp.float32, -bound, bound)
    return w, b


if __name__ == "__main__":
    key = jax.random.PRNGKey(0)
    k_x, k_p = jax.random.split(key)

    # Small batch, CIFAR-like NCHW input: (B=2, C=3, H=32, W=32)
    x = jax.random.normal(k_x, (2, 3, 32, 32), jnp.float32)
    w, b = init_params(k_p)

    # One-time parameter prep (padded / transposed / bf16-cast weights).
    w_padded, b_padded = prepare_params(w, b)

    out = logistic_regression_forward(x, w_padded, b_padded)
    out = jax.block_until_ready(out)
    assert out.shape == (2, OUT_FEATURES)

    # Reference with matching bf16-MXU numerics (x and w rounded to bf16).
    x_flat = x.reshape(-1, IN_FEATURES)
    ref = jnp.dot(x_flat.astype(jnp.bfloat16), w.T.astype(jnp.bfloat16),
                  preferred_element_type=jnp.float32) + b
    assert jnp.allclose(out, ref.astype(out.dtype), atol=1e-3, rtol=1e-3)

    # Loose sanity check against full-precision math.
    ref_f32 = x_flat @ w.T + b
    assert jnp.allclose(out, ref_f32, atol=5e-2, rtol=5e-2)

    print("KERNEL_OK")
</pallas_src>

<mosaic_0001>
module attributes {stable_mosaic.version = 11 : i64} {
  func.func @_linear_kernel(%arg0: i32, %arg1: memref<2x3072xf32, #tpu.memory_space<vmem>>, %arg2: memref<3072x128xbf16, #tpu.memory_space<vmem>>, %arg3: memref<1x128xf32, #tpu.memory_space<vmem>>, %arg4: memref<2x128xf32, #tpu.memory_space<vmem>>) attributes {dimension_semantics = [#tpu.dimension_semantics<parallel>], iteration_bounds = array<i64: 1>, scalar_prefetch = 0 : i64, scratch_operands = 0 : i64, tpu.core_type = #tpu.core_type<tc>, window_params = [{transform_indices = @transform_0, window_bounds = array<i64: 2, 3072>}, {pipeline_mode = #tpu.pipeline_mode<synchronous>, transform_indices = @transform_1, window_bounds = array<i64: 3072, 128>}, {pipeline_mode = #tpu.pipeline_mode<synchronous>, transform_indices = @transform_2, window_bounds = array<i64: 1, 128>}, {transform_indices = @transform_3, window_bounds = array<i64: 2, 128>}]} {
    %c0 = arith.constant 0 : index
    %c0_0 = arith.constant 0 : index
    %0 = vector.load %arg1[%c0, %c0_0] : memref<2x3072xf32, #tpu.memory_space<vmem>>, vector<2x3072xf32>
    %1 = arith.truncf %0 : vector<2x3072xf32> to vector<2x3072xbf16>
    %c0_1 = arith.constant 0 : index
    %c0_2 = arith.constant 0 : index
    %2 = vector.load %arg2[%c0_1, %c0_2] : memref<3072x128xbf16, #tpu.memory_space<vmem>>, vector<3072x128xbf16>
    %cst = arith.constant dense<0.000000e+00> : vector<2x128xf32>
    %3 = tpu.matmul %1, %2, %cst {dimension_numbers = #tpu.dot_dimension_numbers<[1], [0], [0], [1], [0, 0, 1, 1], [], []>} : vector<2x3072xbf16>, vector<3072x128xbf16>, vector<2x128xf32> -> vector<2x128xf32>
    %c0_3 = arith.constant 0 : index
    %c0_4 = arith.constant 0 : index
    %4 = vector.load %arg3[%c0_3, %c0_4] : memref<1x128xf32, #tpu.memory_space<vmem>>, vector<1x128xf32>
    %5 = vector.broadcast %4 : vector<1x128xf32> to vector<2x128xf32>
    %6 = arith.addf %3, %5 : vector<2x128xf32>
    %c0_5 = arith.constant 0 : index
    %c0_6 = arith.constant 0 : index
    %7 = vector.load %arg4[%c0_5, %c0_6] : memref<2x128xf32, #tpu.memory_space<vmem>>, vector<2x128xf32>
    tpu.vector_store %arg4[%c0_5, %c0_6], %6 {strides = array<i32>} : memref<2x128xf32, #tpu.memory_space<vmem>>, vector<2x128xf32>,
    return
  }
  func.func @transform_0(%arg0: i32) -> (i32, i32) {
    %c0_i32 = arith.constant 0 : i32
    %c0_i32_0 = arith.constant 0 : i32
    return %arg0, %c0_i32 : i32, i32
  }
  func.func @transform_1(%arg0: i32) -> (i32, i32) {
    %c0_i32 = arith.constant 0 : i32
    %c0_i32_0 = arith.constant 0 : i32
    %c0_i32_1 = arith.constant 0 : i32
    return %c0_i32, %c0_i32_0 : i32, i32
  }
  func.func @transform_2(%arg0: i32) -> (i32, i32) {
    %c0_i32 = arith.constant 0 : i32
    %c0_i32_0 = arith.constant 0 : i32
    %c0_i32_1 = arith.constant 0 : i32
    return %c0_i32, %c0_i32_0 : i32, i32
  }
  func.func @transform_3(%arg0: i32) -> (i32, i32) {
    %c0_i32 = arith.constant 0 : i32
    %c0_i32_0 = arith.constant 0 : i32
    return %arg0, %c0_i32 : i32, i32
  }
}

</mosaic_0001>

<bundles_post_ra>
// kernel: tpu_custom_call.1
= control target key start
LH: loop header
LB: loop body
LE: loop exit
PB: predicated region body
PF: predicated region fallthrough
CT: control target
= control target key end

     0   :  { %8 = vsyncpa [#allocation3], 0  ;;  %s3023_s0 = inlined_call_operand.hbm [shape: f32[2,3072], index: 0, kind: input, shape index: {}]   ;;  %s3024_s1 = inlined_call_operand.hbm [shape: bf16[3072,128], index: 1, kind: input, shape index: {}]   ;;  %s3025_s2 = inlined_call_operand.vmem [shape: f32[1,128], index: 2, kind: input, shape index: {}]   ;;  %s3026_s3 = inlined_call_operand.hbm [shape: f32[2,128], index: 3, kind: output, shape index: {}]  }
   0x1   :  { %9 = vsyncpa [#allocation6], 0 }
   0x2   :  { %10 = vsyncpa [#allocation4], 0  ;;  %s2971_s12 = smov [#allocation2]   ;;  %s2972_s14 = smov [#allocation5]  }
   0x3   :  { %s17_s13 = sshll.u32 %s2971_s12, 4  ;;  %s26_s15 = sshll.u32 %s2972_s14, 4  ;;  %s18_s13 = int_to_ptr.vmem [resolvable:$true] %s17_s13  ;;  %s27_s15 = int_to_ptr.vmem [resolvable:$true] %s26_s15 }
   0x4   :  { %s2913_s16 = scalar_lea.vmem %s18_s13, 768  ;;  %p2918_p1 = scmp.lt.s32.totalorder %s18_s13, %s18_s13 }
   0x5   :  { %p2914_p0 = scmp.ne.s32.totalorder %s18_s13, %s2913_s16  ;;  %p2919_p2 = scmp.lt.s32.totalorder %s2913_s16, %s2913_s16 }
   0x7   :  { %p2920_p3 = por %p2919_p2, %p2918_p1 }
   0x9   :  { %p2921_p4 = pnand %p2920_p3, %p2914_p0 }
   0xb   :  { %2924 = shalt.err (!%p2921_p4)
}
   0xc   :  { %20 = dma.hbm_to_vmem [thread:$0]  %s3023_s0, 768, %s18_s13, [#allocation3]  }
   0xd   :  { %s2933_s19 = scalar_lea.vmem %s27_s15, 24576  ;;  %p2938_p6 = scmp.lt.s32.totalorder %s27_s15, %s27_s15 }
   0xe   :  { %p2934_p5 = scmp.ne.s32.totalorder %s27_s15, %s2933_s19  ;;  %p2939_p7 = scmp.lt.s32.totalorder %s2933_s19, %s2933_s19 }
  0x10   :  { %p2940_p8 = por %p2939_p7, %p2938_p6 }
  0x12   :  { %p2941_p9 = pnand %p2940_p8, %p2934_p5 }
  0x14   :  { %2944 = shalt.err (!%p2941_p9)
}
  0x15   :  { %s2973_s20 = smov 64   ;;  %s2974_s21 = smov 4  }
  0x16   :  { %32 = dma.hbm_to_vmem [thread:$0]  %s3024_s1, 24576, %s27_s15, [#allocation6], %s2973_s20, %s2973_s20, %s2974_s21  }
  0x17   :  { %2965 = dma.done.wait [#allocation3], 768  }
  0x18   :  { %2966 = vsyncadd [#allocation3], 4294966528 }
  0x19   :  { %2967 = dma.done.wait [#allocation6], 24576  }
  0x1a   :  { %2968 = vsyncadd [#allocation6], 4294942720  ;;  %v2707_v0 = vld [vmem:[#allocation5 + $0x78] sm:$0xff]   ;;  %v2711_v4 = vld [vmem:[#allocation5 + $0x70] sm:$0xff]   ;;  %v2975_v22 = vmov 1983009808   ;;  %v58_v24 = vlaneseq }
  0x1b   :  { %v2708_v1 = vld [vmem:[#allocation5 + $0xf8] sm:$0xff]   ;;  %2437 = vmatprep.subr.bf16.mxu0 %v2707_v0  ;;  %v2712_v5 = vld [vmem:[#allocation5 + $0xf0] sm:$0xff]   ;;  %v2715_v8 = vld [vmem:[#allocation5 + $0x68] sm:$0xff]   ;;  %v56_v23 = vunpack.c.l.s4 %v2975_v22 }
  0x1c   :  { %v2709_v2 = vld [vmem:[#allocation5 + $0x38] sm:$0xff]   ;;  %2459 = vmatprep.subr.bf16.mxu1 %v2708_v1  ;;  %v2713_v6 = vld [vmem:[#allocation5 + $0x30] sm:$0xff]   ;;  %v2716_v9 = vld [vmem:[#allocation5 + $0xe8] sm:$0xff]   ;;  %v59_v30 = vshrl.u32 %v58_v24, 7 }
  0x1d   :  { %v2710_v3 = vld [vmem:[#allocation5 + $0xb8] sm:$0xff]   ;;  %2438 = vmatpush3.bf16.msra.mxu0 %v2709_v2  ;;  %v2714_v7 = vld [vmem:[#allocation5 + $0xb0] sm:$0xff]   ;;  %v2717_v10 = vld [vmem:[#allocation5 + $0x28] sm:$0xff]   ;;  %v57_v29 = vunpack.c.0.s8 %v56_v23 }
  0x1e   :  { %2460 = vmatpush3.bf16.msra.mxu1 %v2710_v3  ;;  %2439 = vmatprep.subr.bf16.mxu0 %v2711_v4  ;;  %v2718_v11 = vld [vmem:[#allocation5 + $0xa8] sm:$0xff]   ;;  %v2719_v12 = vld [vmem:[#allocation5 + $0x60] sm:$0xff]   ;;  %v2723_v16 = vld [vmem:[#allocation5 + $0x58] sm:$0xff]  }
  0x1f   :  { %2461 = vmatprep.subr.bf16.mxu1 %v2712_v5  ;;  %v2720_v13 = vld [vmem:[#allocation5 + $0xe0] sm:$0xff]   ;;  %v2724_v17 = vld [vmem:[#allocation5 + $0xd8] sm:$0xff]   ;;  %v2727_v20 = vld [vmem:[#allocation5 + $0x50] sm:$0xff]   ;;  %v3003_v35 = vsub.s32 %v57_v29, %v59_v30 }
  0x20   :  { %v2721_v14 = vld [vmem:[#allocation5 + $0x20] sm:$0xff]   ;;  %v2725_v18 = vld [vmem:[#allocation5 + $0x18] sm:$0xff]   ;;  %v2728_v21 = vld [vmem:[#allocation5 + $0xd0] sm:$0xff]  }
  0x21   :  { %2440 = vmatpush3.bf16.msra.mxu0 %v2713_v6  ;;  %v2722_v15 = vld [vmem:[#allocation5 + $0xa0] sm:$0xff]   ;;  %v2726_v19 = vld [vmem:[#allocation5 + $0x98] sm:$0xff]   ;;  %v2729_v25 = vld [vmem:[#allocation5 + $0x10] sm:$0xff]  }
  0x22   :  { %2462 = vmatpush3.bf16.msra.mxu1 %v2714_v7  ;;  %2441 = vmatprep.subr.bf16.mxu0 %v2715_v8  ;;  %v2730_v26 = vld [vmem:[#allocation5 + $0x90] sm:$0xff]   ;;  %v2731_v27 = vld [vmem:[#allocation5 + $0x48] sm:$0xff]   ;;  %v2735_v33 = vld [vmem:[#allocation5 + $0x40] sm:$0xff]  }
  0x23   :  { %2463 = vmatprep.subr.bf16.mxu1 %v2716_v9  ;;  %v2732_v28 = vld [vmem:[#allocation5 + $0xc8] sm:$0xff]   ;;  %v2736_v34 = vld [vmem:[#allocation5 + $0xc0] sm:$0xff]   ;;  %v42_v38 = vld [vmem:[#allocation2] sm:$0xff] }
  0x24   :  { %v2733_v31 = vld [vmem:[#allocation5 + $0x8] sm:$0xff]   ;;  %v2737_v36 = vld [vmem:[#allocation5] sm:$0xff]   ;;  %v61_v39 = vrot.slane %v42_v38, %v3003_v35  ;;  %v54_v40 = vcombine.high %v42_v38, %v42_v38  ;;  %v2740_v41 = vld [vmem:[#allocation5 + $0x178] sm:$0xff]  }
  0x25   :  { %2442 = vmatpush3.bf16.msra.mxu0 %v2717_v10  ;;  %v2734_v32 = vld [vmem:[#allocation5 + $0x88] sm:$0xff]   ;;  %v2738_v37 = vld [vmem:[#allocation5 + $0x80] sm:$0xff]   ;;  %v2741_v42 = vld [vmem:[#allocation5 + $0x1f8] sm:$0xff]  }
  0x26   :  { %2464 = vmatpush3.bf16.msra.mxu1 %v2718_v11  ;;  %2443 = vmatprep.subr.bf16.mxu0 %v2719_v12  ;;  %v69_v43 = vcombine.high %v61_v39, %v61_v39  ;;  %v68_v44 = vrot.slane %v54_v40, %v3003_v35  ;;  %v180_v45 = vpack.c.bf16 %v61_v39, %v61_v39  ;;  %v2742_v46 = vld [vmem:[#allocation5 + $0x138] sm:$0xff]   ;;  %v2744_v51 = vld [vmem:[#allocation5 + $0x170] sm:$0xff]   ;;  %v2748_v56 = vld [vmem:[#allocation5 + $0x168] sm:$0xff]  }
  0x27   :  { %2465 = vmatprep.subr.bf16.mxu1 %v2720_v13  ;;  %v2743_v49 = vld [vmem:[#allocation5 + $0x1b8] sm:$0xff]   ;;  %v2745_v53 = vld [vmem:[#allocation5 + $0x1f0] sm:$0xff]   ;;  %v2749_v57 = vld [vmem:[#allocation5 + $0x1e8] sm:$0xff]  }
  0x28   :  { %v181_v47 = vpack.c.bf16 %v69_v43, %v69_v43  ;;  %v70_v48 = vcombine.high %v68_v44, %v68_v44  ;;  %v182_v50 = vpack.c.bf16 %v68_v44, %v68_v44  ;;  %v2746_v54 = vld [vmem:[#allocation5 + $0x130] sm:$0xff]   ;;  %v2750_v58 = vld [vmem:[#allocation5 + $0x128] sm:$0xff]   ;;  %v2752_v60 = vld [vmem:[#allocation5 + $0x160] sm:$0xff]  }
  0x29   :  { %2444 = vmatpush3.bf16.msra.mxu0 %v2721_v14  ;;  %v2747_v55 = vld [vmem:[#allocation5 + $0x1b0] sm:$0xff]   ;;  %v2751_v59 = vld [vmem:[#allocation5 + $0x1a8] sm:$0xff]   ;;  %v2753_v61 = vld [vmem:[#allocation5 + $0x1e0] sm:$0xff]  }
  0x2a   :  { %2466 = vmatpush3.bf16.msra.mxu1 %v2722_v15  ;;  %2445 = vmatprep.subr.bf16.mxu0 %v2723_v16  ;;  %v183_v52 = vpack.c.bf16 %v70_v48, %v70_v48  ;;  %v2754_v62 = vld [vmem:[#allocation5 + $0x120] sm:$0xff]   ;;  %v2756_v0 = vld [vmem:[#allocation5 + $0x158] sm:$0xff]   ;;  %v2760_v4 = vld [vmem:[#allocation5 + $0x150] sm:$0xff]  }
  0x2b   :  { %2467 = vmatprep.subr.bf16.mxu1 %v2724_v17  ;;  %1779 = vmatprep.mubr.bf16.mxu0 %v181_v47  ;;  %v2755_v63 = vld [vmem:[#allocation5 + $0x1a0] sm:$0xff]   ;;  %v2757_v1 = vld [vmem:[#allocation5 + $0x1d8] sm:$0xff]   ;;  %v2761_v5 = vld [vmem:[#allocation5 + $0x1d0] sm:$0xff]  }
  0x2c   :  { %1819 = vmatprep.mubr.bf16.mxu1 %v183_v52  ;;  %v2758_v2 = vld [vmem:[#allocation5 + $0x118] sm:$0xff]   ;;  %v2762_v6 = vld [vmem:[#allocation5 + $0x110] sm:$0xff]   ;;  %v2764_v8 = vld [vmem:[#allocation5 + $0x148] sm:$0xff]  }
  0x2d   :  { %2446 = vmatpush3.bf16.msra.mxu0 %v2725_v18  ;;  %v2759_v3 = vld [vmem:[#allocation5 + $0x198] sm:$0xff]   ;;  %v2763_v7 = vld [vmem:[#allocation5 + $0x190] sm:$0xff]   ;;  %v2765_v9 = vld [vmem:[#allocation5 + $0x1c8] sm:$0xff]  }
  0x2e   :  { %2468 = vmatpush3.bf16.msra.mxu1 %v2726_v19  ;;  %2447 = vmatprep.subr.bf16.mxu0 %v2727_v20  ;;  %v2766_v10 = vld [vmem:[#allocation5 + $0x108] sm:$0xff]   ;;  %v2768_v12 = vld [vmem:[#allocation5 + $0x140] sm:$0xff]   ;;  %v43_v15 = vld [vmem:[#allocation2 + $0x8] sm:$0xff] }
  0x2f   :  { %2469 = vmatprep.subr.bf16.mxu1 %v2728_v21  ;;  %v2767_v11 = vld [vmem:[#allocation5 + $0x188] sm:$0xff]   ;;  %v2769_v13 = vld [vmem:[#allocation5 + $0x1c0] sm:$0xff]   ;;  %v78_v17 = vrot.slane %v43_v15, %v3003_v35  ;;  %v71_v18 = vcombine.high %v43_v15, %v43_v15  ;;  %v2773_v19 = vld [vmem:[#allocation5 + $0x278] sm:$0xff]  }
  0x30   :  { %v2770_v14 = vld [vmem:[#allocation5 + $0x100] sm:$0xff]   ;;  %v2774_v22 = vld [vmem:[#allocation5 + $0x2f8] sm:$0xff]   ;;  %v2777_v29 = vld [vmem:[#allocation5 + $0x270] sm:$0xff]  }
  0x31   :  { %2448 = vmatpush3.bf16.msra.mxu0 %v2729_v25  ;;  %v2771_v16 = vld [vmem:[#allocation5 + $0x180] sm:$0xff]   ;;  %v86_v20 = vcombine.high %v78_v17, %v78_v17  ;;  %v85_v21 = vrot.slane %v71_v18, %v3003_v35  ;;  %v184_v23 = vpack.c.bf16 %v78_v17, %v78_v17  ;;  %v2775_v24 = vld [vmem:[#allocation5 + $0x238] sm:$0xff]   ;;  %v2784_v38 = vld [vmem:[#allocation5 + $0x2a8] sm:$0xff]  }
  0x32   :  { %2470 = vmatpush3.bf16.msra.mxu1 %v2730_v26  ;;  %2449 = vmatprep.subr.bf16.mxu0 %v2731_v27  ;;  %v2776_v27 = vld [vmem:[#allocation5 + $0x2b8] sm:$0xff]   ;;  %v2785_v39 = vld [vmem:[#allocation5 + $0x260] sm:$0xff]   ;;  %v2793_v47 = vld [vmem:[#allocation5 + $0x250] sm:$0xff]  }
  0x33   :  { %2471 = vmatprep.subr.bf16.mxu1 %v2732_v28  ;;  %v185_v25 = vpack.c.bf16 %v86_v20, %v86_v20  ;;  %v87_v26 = vcombine.high %v85_v21, %v85_v21  ;;  %v186_v28 = vpack.c.bf16 %v85_v21, %v85_v21  ;;  %v2786_v40 = vld [vmem:[#allocation5 + $0x2e0] sm:$0xff]   ;;  %v2789_v43 = vld [vmem:[#allocation5 + $0x258] sm:$0xff]   ;;  %v2794_v48 = vld [vmem:[#allocation5 + $0x2d0] sm:$0xff]  }
  0x34   :  { %v2790_v44 = vld [vmem:[#allocation5 + $0x2d8] sm:$0xff]   ;;  %v2798_v52 = vld [vmem:[#allocation5 + $0x2c8] sm:$0xff]   ;;  %v2818_v17 = vld [vmem:[#allocation5 + $0x360] sm:$0xff]  }
  0x35   :  { %2450 = vmatpush3.bf16.msra.mxu0 %v2733_v31  ;;  %v187_v30 = vpack.c.bf16 %v87_v26, %v87_v26  ;;  %v2778_v31 = vld [vmem:[#allocation5 + $0x2f0] sm:$0xff]   ;;  %v2816_v15 = vld [vmem:[#allocation5 + $0x328] sm:$0xff]   ;;  %v2819_v18 = vld [vmem:[#allocation5 + $0x3e0] sm:$0xff]  }
  0x36   :  { %2472 = vmatpush3.bf16.msra.mxu1 %v2734_v32  ;;  %2451 = vmatprep.subr.bf16.mxu0 %v2735_v33  ;;  %v2779_v32 = vld [vmem:[#allocation5 + $0x230] sm:$0xff]   ;;  %v2821_v20 = vld [vmem:[#allocation5 + $0x3a0] sm:$0xff]   ;;  %v2822_v21 = vld [vmem:[#allocation5 + $0x358] sm:$0xff]  }
  0x37   :  { %2473 = vmatprep.subr.bf16.mxu1 %v2736_v34  ;;  %v2780_v33 = vld [vmem:[#allocation5 + $0x2b0] sm:$0xff]   ;;  %v2781_v34 = vld [vmem:[#allocation5 + $0x268] sm:$0xff]  }
  0x38   :  { %v2827_v26 = vld [vmem:[#allocation5 + $0x3d0] sm:$0xff]  }
  0x39   :  { %2452 = vmatpush3.bf16.msra.mxu0 %v2737_v36  ;;  %v2782_v36 = vld [vmem:[#allocation5 + $0x2e8] sm:$0xff]  }
  0x3a   :  { %2474 = vmatpush3.bf16.msra.mxu1 %v2738_v37  ;;  %2481 = vmatprep.subr.bf16.mxu0 %v2740_v41  ;;  %v2783_v37 = vld [vmem:[#allocation5 + $0x228] sm:$0xff]   ;;  %v2787_v41 = vld [vmem:[#allocation5 + $0x220] sm:$0xff]  }
  0x3b   :  { %2503 = vmatprep.subr.bf16.mxu1 %v2741_v42  ;;  %v2788_v42 = vld [vmem:[#allocation5 + $0x2a0] sm:$0xff]  }
  0x3c   :  { %1780 = vmatmul.mubr.bf16.vlgmr.msra.gmra.mxu0 %v180_v45  ;;  %v2791_v45 = vld [vmem:[#allocation5 + $0x218] sm:$0xff]  }
  0x3d   :  { %2482 = vmatpush3.bf16.msra.mxu0 %v2742_v46  ;;  %1820 = vmatmul.mubr.bf16.vlgmr.msra.gmra.mxu1 %v182_v50  ;;  %v2792_v46 = vld [vmem:[#allocation5 + $0x298] sm:$0xff]   ;;  %v2796_v50 = vld [vmem:[#allocation5 + $0x290] sm:$0xff]  }
  0x3e   :  { %2483 = vmatprep.subr.bf16.mxu0 %v2744_v51  ;;  %2504 = vmatpush3.bf16.msra.mxu1 %v2743_v49  ;;  %v2795_v49 = vld [vmem:[#allocation5 + $0x210] sm:$0xff]   ;;  %v2797_v51 = vld [vmem:[#allocation5 + $0x248] sm:$0xff]  }
  0x3f   :  { %2505 = vmatprep.subr.bf16.mxu1 %v2745_v53  ;;  %1859 = vmatprep.mubr.bf16.mxu0 %v185_v25  ;;  %v2799_v53 = vld [vmem:[#allocation5 + $0x208] sm:$0xff]   ;;  %v2826_v25 = vld [vmem:[#allocation5 + $0x350] sm:$0xff]  }
  0x40   :  { %1899 = vmatprep.mubr.bf16.mxu1 %v187_v30  ;;  %v2831_v30 = vld [vmem:[#allocation5 + $0x3c8] sm:$0xff]  }
  0x41   :  { %2484 = vmatpush3.bf16.msra.mxu0 %v2746_v54  ;;  %v2800_v54 = vld [vmem:[#allocation5 + $0x288] sm:$0xff]  }
  0x42   :  { %2485 = vmatprep.subr.bf16.mxu0 %v2748_v56  ;;  %2506 = vmatpush3.bf16.msra.mxu1 %v2747_v55  ;;  %v2801_v55 = vld [vmem:[#allocation5 + $0x240] sm:$0xff]  }
  0x43   :  { %2507 = vmatprep.subr.bf16.mxu1 %v2749_v57  ;;  %v2802_v56 = vld [vmem:[#allocation5 + $0x2c0] sm:$0xff]  }
  0x44   :  { %v2803_v57 = vld [vmem:[#allocation5 + $0x200] sm:$0xff]  }
  0x45   :  { %2486 = vmatpush3.bf16.msra.mxu0 %v2750_v58  ;;  %v44_v58 = vld [vmem:[#allocation2 + $0x10] sm:$0xff] }
  0x46   :  { %2487 = vmatprep.subr.bf16.mxu0 %v2752_v60  ;;  %2508 = vmatpush3.bf16.msra.mxu1 %v2751_v59  ;;  %v2804_v59 = vld [vmem:[#allocation5 + $0x280] sm:$0xff]   ;;  %v95_v60 = vrot.slane %v44_v58, %v3003_v35 }
  0x47   :  { %2509 = vmatprep.subr.bf16.mxu1 %v2753_v61  ;;  %v88_v61 = vcombine.high %v44_v58, %v44_v58  ;;  %v2849_v58 = vld [vmem:[#allocation5 + $0x428] sm:$0xff]  }
  0x49   :  { %2488 = vmatpush3.bf16.msra.mxu0 %v2754_v62  ;;  %v2806_v62 = vld [vmem:[#allocation5 + $0x378] sm:$0xff]  }
  0x4a   :  { %2489 = vmatprep.subr.bf16.mxu0 %v2756_v0  ;;  %2510 = vmatpush3.bf16.msra.mxu1 %v2755_v63  ;;  %v103_v63 = vcombine.high %v95_v60, %v95_v60  ;;  %v102_v0 = vrot.slane %v88_v61, %v3003_v35  ;;  %v2852_v61 = vld [vmem:[#allocation5 + $0x4e0] sm:$0xff]  }
  0x4b   :  { %2511 = vmatprep.subr.bf16.mxu1 %v2757_v1  ;;  %v2807_v1 = vld [vmem:[#allocation5 + $0x3f8] sm:$0xff]  }
  0x4d   :  { %2490 = vmatpush3.bf16.msra.mxu0 %v2758_v2  ;;  %v188_v2 = vpack.c.bf16 %v95_v60, %v95_v60  ;;  %v2850_v60 = vld [vmem:[#allocation5 + $0x4a8] sm:$0xff]  }
  0x4e   :  { %2491 = vmatprep.subr.bf16.mxu0 %v2760_v4  ;;  %2512 = vmatpush3.bf16.msra.mxu1 %v2759_v3  ;;  %v2808_v3 = vld [vmem:[#allocation5 + $0x338] sm:$0xff]   ;;  %v189_v4 = vpack.c.bf16 %v103_v63, %v103_v63 }
  0x4f   :  { %2513 = vmatprep.subr.bf16.mxu1 %v2761_v5  ;;  %v104_v5 = vcombine.high %v102_v0, %v102_v0  ;;  %v2855_v63 = vld [vmem:[#allocation5 + $0x458] sm:$0xff]  }
  0x51   :  { %2492 = vmatpush3.bf16.msra.mxu0 %v2762_v6  ;;  %v2809_v6 = vld [vmem:[#allocation5 + $0x3b8] sm:$0xff]  }
  0x52   :  { %2493 = vmatprep.subr.bf16.mxu0 %v2764_v8  ;;  %2514 = vmatpush3.bf16.msra.mxu1 %v2763_v7  ;;  %v190_v7 = vpack.c.bf16 %v102_v0, %v102_v0  ;;  %v2810_v8 = vld [vmem:[#allocation5 + $0x370] sm:$0xff]   ;;  %v2854_v0 = vld [vmem:[#allocation5 + $0x4a0] sm:$0xff]  }
  0x53   :  { %2515 = vmatprep.subr.bf16.mxu1 %v2765_v9  ;;  %v191_v9 = vpack.c.bf16 %v104_v5, %v104_v5  ;;  %v2860_v5 = vld [vmem:[#allocation5 + $0x4d0] sm:$0xff]  }
  0x55   :  { %2494 = vmatpush3.bf16.msra.mxu0 %v2766_v10  ;;  %v2811_v10 = vld [vmem:[#allocation5 + $0x3f0] sm:$0xff]  }
  0x56   :  { %2495 = vmatprep.subr.bf16.mxu0 %v2768_v12  ;;  %2516 = vmatpush3.bf16.msra.mxu1 %v2767_v11  ;;  %v2812_v11 = vld [vmem:[#allocation5 + $0x330] sm:$0xff]  }
  0x57   :  { %2517 = vmatprep.subr.bf16.mxu1 %v2769_v13  ;;  %v2813_v12 = vld [vmem:[#allocation5 + $0x3b0] sm:$0xff]   ;;  %v2814_v13 = vld [vmem:[#allocation5 + $0x368] sm:$0xff]  }
  0x59   :  { %2496 = vmatpush3.bf16.msra.mxu0 %v2770_v14  ;;  %v2815_v14 = vld [vmem:[#allocation5 + $0x3e8] sm:$0xff]  }
  0x5a   :  { %2525 = vmatprep.subr.bf16.mxu0 %v2773_v19  ;;  %2518 = vmatpush3.bf16.msra.mxu1 %v2771_v16  ;;  %v2817_v16 = vld [vmem:[#allocation5 + $0x3a8] sm:$0xff]   ;;  %v2820_v19 = vld [vmem:[#allocation5 + $0x320] sm:$0xff]  }
  0x5b   :  { %2547 = vmatprep.subr.bf16.mxu1 %v2774_v22  ;;  %v2823_v22 = vld [vmem:[#allocation5 + $0x3d8] sm:$0xff]  }
  0x5c   :  { %1860 = vmatmul.mubr.bf16.vlgmr.msra.gmra.mxu0 %v184_v23  ;;  %v2824_v23 = vld [vmem:[#allocation5 + $0x318] sm:$0xff]  }
  0x5d   :  { %2526 = vmatpush3.bf16.msra.mxu0 %v2775_v24  ;;  %1900 = vmatmul.mubr.bf16.vlgmr.msra.gmra.mxu1 %v186_v28  ;;  %v2825_v24 = vld [vmem:[#allocation5 + $0x398] sm:$0xff]   ;;  %v2829_v28 = vld [vmem:[#allocation5 + $0x390] sm:$0xff]  }
  0x5e   :  { %2527 = vmatprep.subr.bf16.mxu0 %v2777_v29  ;;  %2548 = vmatpush3.bf16.msra.mxu1 %v2776_v27  ;;  %v2828_v27 = vld [vmem:[#allocation5 + $0x310] sm:$0xff]   ;;  %v2830_v29 = vld [vmem:[#allocation5 + $0x348] sm:$0xff]  }
  0x5f   :  { %2549 = vmatprep.subr.bf16.mxu1 %v2778_v31  ;;  %1939 = vmatprep.mubr.bf16.mxu0 %v189_v4  ;;  %v2832_v31 = vld [vmem:[#allocation5 + $0x308] sm:$0xff]   ;;  %v2858_v4 = vld [vmem:[#allocation5 + $0x498] sm:$0xff]  }
  0x60   :  { %1979 = vmatprep.mubr.bf16.mxu1 %v191_v9  ;;  %v2864_v9 = vld [vmem:[#allocation5 + $0x4c8] sm:$0xff]  }
  0x61   :  { %2528 = vmatpush3.bf16.msra.mxu0 %v2779_v32  ;;  %v2833_v32 = vld [vmem:[#allocation5 + $0x388] sm:$0xff]  }
  0x62   :  { %2529 = vmatprep.subr.bf16.mxu0 %v2781_v34  ;;  %2550 = vmatpush3.bf16.msra.mxu1 %v2780_v33  ;;  %v2834_v33 = vld [vmem:[#allocation5 + $0x340] sm:$0xff]  }
  0x63   :  { %2551 = vmatprep.subr.bf16.mxu1 %v2782_v36  ;;  %v2835_v34 = vld [vmem:[#allocation5 + $0x3c0] sm:$0xff]  }
  0x64   :  { %v2836_v36 = vld [vmem:[#allocation5 + $0x300] sm:$0xff]  }
  0x65   :  { %2530 = vmatpush3.bf16.msra.mxu0 %v2783_v37  ;;  %v45_v37 = vld [vmem:[#allocation2 + $0x18] sm:$0xff] }
  0x66   :  { %2531 = vmatprep.subr.bf16.mxu0 %v2785_v39  ;;  %2552 = vmatpush3.bf16.msra.mxu1 %v2784_v38  ;;  %v112_v38 = vrot.slane %v45_v37, %v3003_v35  ;;  %v105_v39 = vcombine.high %v45_v37, %v45_v37  ;;  %v2882_v37 = vld [vmem:[#allocation5 + $0x528] sm:$0xff]  }
  0x67   :  { %2553 = vmatprep.subr.bf16.mxu1 %v2786_v40  ;;  %v2839_v40 = vld [vmem:[#allocation5 + $0x478] sm:$0xff]  }
  0x69   :  { %2532 = vmatpush3.bf16.msra.mxu0 %v2787_v41  ;;  %v2837_v41 = vld [vmem:[#allocation5 + $0x380] sm:$0xff]  }
  0x6a   :  { %2533 = vmatprep.subr.bf16.mxu0 %v2789_v43  ;;  %2554 = vmatpush3.bf16.msra.mxu1 %v2788_v42  ;;  %v120_v42 = vcombine.high %v112_v38, %v112_v38  ;;  %v119_v43 = vrot.slane %v105_v39, %v3003_v35  ;;  %v2883_v39 = vld [vmem:[#allocation5 + $0x5a8] sm:$0xff]  }
  0x6b   :  { %2555 = vmatprep.subr.bf16.mxu1 %v2790_v44  ;;  %v2840_v44 = vld [vmem:[#allocation5 + $0x4f8] sm:$0xff]  }
  0x6d   :  { %2534 = vmatpush3.bf16.msra.mxu0 %v2791_v45  ;;  %v192_v45 = vpack.c.bf16 %v112_v38, %v112_v38  ;;  %v2884_v38 = vld [vmem:[#allocation5 + $0x560] sm:$0xff]  }
  0x6e   :  { %2535 = vmatprep.subr.bf16.mxu0 %v2793_v47  ;;  %2556 = vmatpush3.bf16.msra.mxu1 %v2792_v46  ;;  %v193_v46 = vpack.c.bf16 %v120_v42, %v120_v42  ;;  %v121_v47 = vcombine.high %v119_v43, %v119_v43  ;;  %v2888_v42 = vld [vmem:[#allocation5 + $0x558] sm:$0xff]  }
  0x6f   :  { %2557 = vmatprep.subr.bf16.mxu1 %v2794_v48  ;;  %v2841_v48 = vld [vmem:[#allocation5 + $0x438] sm:$0xff]  }
  0x71   :  { %2536 = vmatpush3.bf16.msra.mxu0 %v2795_v49  ;;  %v194_v49 = vpack.c.bf16 %v119_v43, %v119_v43  ;;  %v2887_v43 = vld [vmem:[#allocation5 + $0x5a0] sm:$0xff]  }
  0x72   :  { %2537 = vmatprep.subr.bf16.mxu0 %v2797_v51  ;;  %2558 = vmatpush3.bf16.msra.mxu1 %v2796_v50  ;;  %v2843_v50 = vld [vmem:[#allocation5 + $0x470] sm:$0xff]   ;;  %v195_v51 = vpack.c.bf16 %v121_v47, %v121_v47  ;;  %v2891_v47 = vld [vmem:[#allocation5 + $0x598] sm:$0xff]  }
  0x73   :  { %2559 = vmatprep.subr.bf16.mxu1 %v2798_v52  ;;  %v2842_v52 = vld [vmem:[#allocation5 + $0x4b8] sm:$0xff]  }
  0x75   :  { %2538 = vmatpush3.bf16.msra.mxu0 %v2799_v53  ;;  %v2844_v53 = vld [vmem:[#allocation5 + $0x4f0] sm:$0xff]  }
  0x76   :  { %2539 = vmatprep.subr.bf16.mxu0 %v2801_v55  ;;  %2560 = vmatpush3.bf16.msra.mxu1 %v2800_v54  ;;  %v2845_v54 = vld [vmem:[#allocation5 + $0x430] sm:$0xff]   ;;  %v2847_v55 = vld [vmem:[#allocation5 + $0x468] sm:$0xff]  }
  0x77   :  { %2561 = vmatprep.subr.bf16.mxu1 %v2802_v56  ;;  %v2846_v56 = vld [vmem:[#allocation5 + $0x4b0] sm:$0xff]  }
  0x79   :  { %2540 = vmatpush3.bf16.msra.mxu0 %v2803_v57  ;;  %v2848_v57 = vld [vmem:[#allocation5 + $0x4e8] sm:$0xff]  }
  0x7a   :  { %2569 = vmatprep.subr.bf16.mxu0 %v2806_v62  ;;  %2562 = vmatpush3.bf16.msra.mxu1 %v2804_v59  ;;  %v2851_v59 = vld [vmem:[#allocation5 + $0x460] sm:$0xff]  }
  0x7b   :  { %2591 = vmatprep.subr.bf16.mxu1 %v2807_v1  ;;  %v2853_v62 = vld [vmem:[#allocation5 + $0x420] sm:$0xff]   ;;  %v2856_v1 = vld [vmem:[#allocation5 + $0x4d8] sm:$0xff]  }
  0x7c   :  { %1940 = vmatmul.mubr.bf16.vlgmr.msra.gmra.mxu0 %v188_v2  ;;  %v2857_v2 = vld [vmem:[#allocation5 + $0x418] sm:$0xff]  }
  0x7d   :  { %2570 = vmatpush3.bf16.msra.mxu0 %v2808_v3  ;;  %1980 = vmatmul.mubr.bf16.vlgmr.msra.gmra.mxu1 %v190_v7  ;;  %v2859_v3 = vld [vmem:[#allocation5 + $0x450] sm:$0xff]   ;;  %v2863_v7 = vld [vmem:[#allocation5 + $0x448] sm:$0xff]  }
  0x7e   :  { %2571 = vmatprep.subr.bf16.mxu0 %v2810_v8  ;;  %2592 = vmatpush3.bf16.msra.mxu1 %v2809_v6  ;;  %v2861_v6 = vld [vmem:[#allocation5 + $0x410] sm:$0xff]  }
  0x7f   :  { %2593 = vmatprep.subr.bf16.mxu1 %v2811_v10  ;;  %2019 = vmatprep.mubr.bf16.mxu0 %v193_v46  ;;  %v2862_v8 = vld [vmem:[#allocation5 + $0x490] sm:$0xff]   ;;  %v2865_v10 = vld [vmem:[#allocation5 + $0x408] sm:$0xff]  }
  0x80   :  { %2059 = vmatprep.mubr.bf16.mxu1 %v195_v51  ;;  %v2892_v46 = vld [vmem:[#allocation5 + $0x550] sm:$0xff]  }
  0x81   :  { %2572 = vmatpush3.bf16.msra.mxu0 %v2812_v11  ;;  %v2867_v11 = vld [vmem:[#allocation5 + $0x440] sm:$0xff]   ;;  %v2895_v51 = vld [vmem:[#allocation5 + $0x590] sm:$0xff]  }
  0x82   :  { %2573 = vmatprep.subr.bf16.mxu0 %v2814_v13  ;;  %2594 = vmatpush3.bf16.msra.mxu1 %v2813_v12  ;;  %v2866_v12 = vld [vmem:[#allocation5 + $0x488] sm:$0xff]   ;;  %v2868_v13 = vld [vmem:[#allocation5 + $0x4c0] sm:$0xff]  }
  0x83   :  { %2595 = vmatprep.subr.bf16.mxu1 %v2815_v14  ;;  %v46_v14 = vld [vmem:[#allocation2 + $0x20] sm:$0xff] }
  0x85   :  { %2574 = vmatpush3.bf16.msra.mxu0 %v2816_v15  ;;  %v2869_v15 = vld [vmem:[#allocation5 + $0x400] sm:$0xff]  }
  0x86   :  { %2575 = vmatprep.subr.bf16.mxu0 %v2818_v17  ;;  %2596 = vmatpush3.bf16.msra.mxu1 %v2817_v16  ;;  %v129_v16 = vrot.slane %v46_v14, %v3003_v35  ;;  %v122_v17 = vcombine.high %v46_v14, %v46_v14 }
  0x87   :  { %2597 = vmatprep.subr.bf16.mxu1 %v2819_v18  ;;  %v2872_v18 = vld [vmem:[#allocation5 + $0x578] sm:$0xff]  }
  0x89   :  { %2576 = vmatpush3.bf16.msra.mxu0 %v2820_v19  ;;  %v2870_v19 = vld [vmem:[#allocation5 + $0x480] sm:$0xff]  }
  0x8a   :  { %2577 = vmatprep.subr.bf16.mxu0 %v2822_v21  ;;  %2598 = vmatpush3.bf16.msra.mxu1 %v2821_v20  ;;  %v137_v20 = vcombine.high %v129_v16, %v129_v16  ;;  %v136_v21 = vrot.slane %v122_v17, %v3003_v35 }
  0x8b   :  { %2599 = vmatprep.subr.bf16.mxu1 %v2823_v22  ;;  %v196_v22 = vpack.c.bf16 %v129_v16, %v129_v16 }
  0x8d   :  { %2578 = vmatpush3.bf16.msra.mxu0 %v2824_v23  ;;  %v2873_v23 = vld [vmem:[#allocation5 + $0x5f8] sm:$0xff]  }
  0x8e   :  { %2579 = vmatprep.subr.bf16.mxu0 %v2826_v25  ;;  %2600 = vmatpush3.bf16.msra.mxu1 %v2825_v24  ;;  %v197_v24 = vpack.c.bf16 %v137_v20, %v137_v20  ;;  %v138_v25 = vcombine.high %v136_v21, %v136_v21 }
  0x8f   :  { %2601 = vmatprep.subr.bf16.mxu1 %v2827_v26  ;;  %v2874_v26 = vld [vmem:[#allocation5 + $0x538] sm:$0xff]  }
  0x91   :  { %2580 = vmatpush3.bf16.msra.mxu0 %v2828_v27  ;;  %v198_v27 = vpack.c.bf16 %v136_v21, %v136_v21 }
  0x92   :  { %2581 = vmatprep.subr.bf16.mxu0 %v2830_v29  ;;  %2602 = vmatpush3.bf16.msra.mxu1 %v2829_v28  ;;  %v2876_v28 = vld [vmem:[#allocation5 + $0x570] sm:$0xff]   ;;  %v199_v29 = vpack.c.bf16 %v138_v25, %v138_v25 }
  0x93   :  { %2603 = vmatprep.subr.bf16.mxu1 %v2831_v30  ;;  %v2875_v30 = vld [vmem:[#allocation5 + $0x5b8] sm:$0xff]  }
  0x95   :  { %2582 = vmatpush3.bf16.msra.mxu0 %v2832_v31  ;;  %v2877_v31 = vld [vmem:[#allocation5 + $0x5f0] sm:$0xff]  }
  0x96   :  { %2583 = vmatprep.subr.bf16.mxu0 %v2834_v33  ;;  %2604 = vmatpush3.bf16.msra.mxu1 %v2833_v32  ;;  %v2878_v32 = vld [vmem:[#allocation5 + $0x530] sm:$0xff]   ;;  %v2880_v33 = vld [vmem:[#allocation5 + $0x568] sm:$0xff]  }
  0x97   :  { %2605 = vmatprep.subr.bf16.mxu1 %v2835_v34  ;;  %v2879_v34 = vld [vmem:[#allocation5 + $0x5b0] sm:$0xff]  }
  0x99   :  { %2584 = vmatpush3.bf16.msra.mxu0 %v2836_v36  ;;  %v2881_v36 = vld [vmem:[#allocation5 + $0x5e8] sm:$0xff]  }
  0x9a   :  { %2613 = vmatprep.subr.bf16.mxu0 %v2839_v40  ;;  %2606 = vmatpush3.bf16.msra.mxu1 %v2837_v41  ;;  %v2885_v40 = vld [vmem:[#allocation5 + $0x5e0] sm:$0xff]  }
  0x9b   :  { %2635 = vmatprep.subr.bf16.mxu1 %v2840_v44  ;;  %v2886_v41 = vld [vmem:[#allocation5 + $0x520] sm:$0xff]   ;;  %v2889_v44 = vld [vmem:[#allocation5 + $0x5d8] sm:$0xff]  }
  0x9c   :  { %2020 = vmatmul.mubr.bf16.vlgmr.msra.gmra.mxu0 %v192_v45  ;;  %v2890_v45 = vld [vmem:[#allocation5 + $0x518] sm:$0xff]  }
  0x9d   :  { %2614 = vmatpush3.bf16.msra.mxu0 %v2841_v48  ;;  %2060 = vmatmul.mubr.bf16.vlgmr.msra.gmra.mxu1 %v194_v49  ;;  %v2893_v48 = vld [vmem:[#allocation5 + $0x5d0] sm:$0xff]  }
  0x9e   :  { %2615 = vmatprep.subr.bf16.mxu0 %v2843_v50  ;;  %2636 = vmatpush3.bf16.msra.mxu1 %v2842_v52  ;;  %v2894_v49 = vld [vmem:[#allocation5 + $0x510] sm:$0xff]   ;;  %v2896_v50 = vld [vmem:[#allocation5 + $0x548] sm:$0xff]  }
  0x9f   :  { %2637 = vmatprep.subr.bf16.mxu1 %v2844_v53  ;;  %2099 = vmatprep.mubr.bf16.mxu0 %v197_v24  ;;  %v2897_v52 = vld [vmem:[#allocation5 + $0x5c8] sm:$0xff]  }
  0xa0   :  { %2139 = vmatprep.mubr.bf16.mxu1 %v199_v29  ;;  %v2898_v53 = vld [vmem:[#allocation5 + $0x508] sm:$0xff]  }
  0xa1   :  { %2616 = vmatpush3.bf16.msra.mxu0 %v2845_v54  ;;  %v2900_v54 = vld [vmem:[#allocation5 + $0x540] sm:$0xff]  }
  0xa2   :  { %2617 = vmatprep.subr.bf16.mxu0 %v2847_v55  ;;  %2638 = vmatpush3.bf16.msra.mxu1 %v2846_v56  ;;  %v2899_v55 = vld [vmem:[#allocation5 + $0x588] sm:$0xff]   ;;  %v2901_v56 = vld [vmem:[#allocation5 + $0x5c0] sm:$0xff]  }
  0xa3   :  { %2639 = vmatprep.subr.bf16.mxu1 %v2848_v57  ;;  %v47_v57 = vld [vmem:[#allocation2 + $0x28] sm:$0xff] }
  0xa5   :  { %2618 = vmatpush3.bf16.msra.mxu0 %v2849_v58  ;;  %v2902_v58 = vld [vmem:[#allocation5 + $0x500] sm:$0xff]  }
  0xa6   :  { %2619 = vmatprep.subr.bf16.mxu0 %v2851_v59  ;;  %2640 = vmatpush3.bf16.msra.mxu1 %v2850_v60  ;;  %v146_v59 = vrot.slane %v47_v57, %v3003_v35  ;;  %v139_v60 = vcombine.high %v47_v57, %v47_v57 }
  0xa7   :  { %2641 = vmatprep.subr.bf16.mxu1 %v2852_v61  ;;  %v2903_v61 = vld [vmem:[#allocation5 + $0x580] sm:$0xff]  }
  0xa9   :  { %2620 = vmatpush3.bf16.msra.mxu0 %v2853_v62  ;;  %v154_v62 = vcombine.high %v146_v59, %v146_v59 }
  0xaa   :  { %2621 = vmatprep.subr.bf16.mxu0 %v2855_v63  ;;  %2642 = vmatpush3.bf16.msra.mxu1 %v2854_v0  ;;  %v153_v63 = vrot.slane %v139_v60, %v3003_v35  ;;  %v200_v0 = vpack.c.bf16 %v146_v59, %v146_v59 }
  0xab   :  { %2643 = vmatprep.subr.bf16.mxu1 %v2856_v1  ;;  %v201_v1 = vpack.c.bf16 %v154_v62, %v154_v62 }
  0xad   :  { %2622 = vmatpush3.bf16.msra.mxu0 %v2857_v2  ;;  %v155_v2 = vcombine.high %v153_v63, %v153_v63 }
  0xae   :  { %2623 = vmatprep.subr.bf16.mxu0 %v2859_v3  ;;  %2644 = vmatpush3.bf16.msra.mxu1 %v2858_v4  ;;  %v202_v3 = vpack.c.bf16 %v153_v63, %v153_v63 }
  0xaf   :  { %2645 = vmatprep.subr.bf16.mxu1 %v2860_v5  ;;  %v203_v4 = vpack.c.bf16 %v155_v2, %v155_v2 }
  0xb1   :  { %2624 = vmatpush3.bf16.msra.mxu0 %v2861_v6 }
  0xb2   :  { %2625 = vmatprep.subr.bf16.mxu0 %v2863_v7  ;;  %2646 = vmatpush3.bf16.msra.mxu1 %v2862_v8  ;;  %v2244_v7 = vld [vmem:[%s3025_s2] ss:$0 sm:$0xff]  ;;  %s2976_s2 = smov [#allocation7]  }
  0xb3   :  { %2647 = vmatprep.subr.bf16.mxu1 %v2864_v9  ;;  %s2234_s24 = sshll.u32 %s2976_s2, 4  ;;  %s2235_s24 = int_to_ptr.vmem [resolvable:$true] %s2234_s24 }
  0xb4   :  { %s2945_s25 = scalar_lea.vmem %s2235_s24, 32  ;;  %p2950_p11 = scmp.lt.s32.totalorder %s2235_s24, %s2235_s24 }
  0xb5   :  { %2626 = vmatpush3.bf16.msra.mxu0 %v2865_v10  ;;  %p2946_p10 = scmp.ne.s32.totalorder %s2235_s24, %s2945_s25  ;;  %p2951_p12 = scmp.lt.s32.totalorder %s2945_s25, %s2945_s25 }
  0xb6   :  { %2627 = vmatprep.subr.bf16.mxu0 %v2867_v11  ;;  %2648 = vmatpush3.bf16.msra.mxu1 %v2866_v12 }
  0xb7   :  { %2649 = vmatprep.subr.bf16.mxu1 %v2868_v13  ;;  %p2952_p13 = por %p2951_p12, %p2950_p11 }
  0xb9   :  { %2628 = vmatpush3.bf16.msra.mxu0 %v2869_v15  ;;  %p2953_p0 = pnand %p2952_p13, %p2946_p10 }
  0xba   :  { %2657 = vmatprep.subr.bf16.mxu0 %v2872_v18  ;;  %2650 = vmatpush3.bf16.msra.mxu1 %v2870_v19 }
  0xbb   :  { %2679 = vmatprep.subr.bf16.mxu1 %v2873_v23 }
  0xbc   :  { %2100 = vmatmul.mubr.bf16.vlgmr.msra.gmra.mxu0 %v196_v22 }
  0xbd   :  { %2658 = vmatpush3.bf16.msra.mxu0 %v2874_v26  ;;  %2140 = vmatmul.mubr.bf16.vlgmr.msra.gmra.mxu1 %v198_v27 }
  0xbe   :  { %2659 = vmatprep.subr.bf16.mxu0 %v2876_v28  ;;  %2680 = vmatpush3.bf16.msra.mxu1 %v2875_v30 }
  0xbf   :  { %2681 = vmatprep.subr.bf16.mxu1 %v2877_v31  ;;  %2179 = vmatprep.mubr.bf16.mxu0 %v201_v1 }
  0xc0   :  { %2219 = vmatprep.mubr.bf16.mxu1 %v203_v4 }
  0xc1   :  { %2660 = vmatpush3.bf16.msra.mxu0 %v2878_v32 }
  0xc2   :  { %2661 = vmatprep.subr.bf16.mxu0 %v2880_v33  ;;  %2682 = vmatpush3.bf16.msra.mxu1 %v2879_v34 }
  0xc3   :  { %2683 = vmatprep.subr.bf16.mxu1 %v2881_v36 }
  0xc5   :  { %2662 = vmatpush3.bf16.msra.mxu0 %v2882_v37 }
  0xc6   :  { %2663 = vmatprep.subr.bf16.mxu0 %v2884_v38  ;;  %2684 = vmatpush3.bf16.msra.mxu1 %v2883_v39 }
  0xc7   :  { %2685 = vmatprep.subr.bf16.mxu1 %v2885_v40 }
  0xc9   :  { %2664 = vmatpush3.bf16.msra.mxu0 %v2886_v41 }
  0xca   :  { %2665 = vmatprep.subr.bf16.mxu0 %v2888_v42  ;;  %2686 = vmatpush3.bf16.msra.mxu1 %v2887_v43 }
  0xcb   :  { %2687 = vmatprep.subr.bf16.mxu1 %v2889_v44 }
  0xcd   :  { %2666 = vmatpush3.bf16.msra.mxu0 %v2890_v45 }
  0xce   :  { %2667 = vmatprep.subr.bf16.mxu0 %v2892_v46  ;;  %2688 = vmatpush3.bf16.msra.mxu1 %v2891_v47 }
  0xcf   :  { %2689 = vmatprep.subr.bf16.mxu1 %v2893_v48 }
  0xd1   :  { %2668 = vmatpush3.bf16.msra.mxu0 %v2894_v49 }
  0xd2   :  { %2669 = vmatprep.subr.bf16.mxu0 %v2896_v50  ;;  %2690 = vmatpush3.bf16.msra.mxu1 %v2895_v51 }
  0xd3   :  { %2691 = vmatprep.subr.bf16.mxu1 %v2897_v52 }
  0xd5   :  { %2670 = vmatpush3.bf16.msra.mxu0 %v2898_v53 }
  0xd6   :  { %2671 = vmatprep.subr.bf16.mxu0 %v2900_v54  ;;  %2692 = vmatpush3.bf16.msra.mxu1 %v2899_v55 }
  0xd7   :  { %2693 = vmatprep.subr.bf16.mxu1 %v2901_v56 }
  0xd9   :  { %2672 = vmatpush3.bf16.msra.mxu0 %v2902_v58 }
  0xda   :  { %2694 = vmatpush3.bf16.msra.mxu1 %v2903_v61 }
  0xdc   :  { %2180 = vmatmul.mubr.bf16.vlgmr.msra.gmra.mxu0 %v200_v0 }
  0xdd   :  { %2220 = vmatmul.mubr.bf16.vlgmr.msra.gmra.mxu1 %v202_v3 }
  0xfc   :  { %v2453_v5 = vpop.f32.mrf.mxu0 }
  0xfd   :  { %v2475_v6 = vpop.f32.mrf.mxu1 }
  0xfe   :  { %v2454_v8 = vpop.f32.mrf.mxu0 }
  0xff   :  { %v2455_v35 = vadd.f32 %v2454_v8, %v2453_v5  ;;  %v2476_v9 = vpop.f32.mrf.mxu1 }
 0x100   :  { %v2456_v10 = vpop.f32.mrf.mxu0  ;;  %v2477_v12 = vadd.f32 %v2476_v9, %v2475_v6 }
 0x101   :  { %v1782_v11 = vadd.f32 %v2455_v35, %v2244_v7  ;;  %v2478_v13 = vpop.f32.mrf.mxu1 }
 0x102   :  { %v2457_v14 = vpop.f32.mrf.mxu0 }
 0x103   :  { %v1822_v15 = vadd.f32 %v2477_v12, %v1782_v11  ;;  %v2479_v16 = vpop.f32.mrf.mxu1 }
 0x11c   :  { %v2497_v17 = vpop.f32.mrf.mxu0 }
 0x11d   :  { %v2519_v18 = vpop.f32.mrf.mxu1 }
 0x11e   :  { %v2498_v19 = vpop.f32.mrf.mxu0 }
 0x11f   :  { %v2499_v20 = vadd.f32 %v2498_v19, %v2497_v17  ;;  %v2520_v21 = vpop.f32.mrf.mxu1 }
 0x120   :  { %v2500_v22 = vpop.f32.mrf.mxu0  ;;  %v2521_v24 = vadd.f32 %v2520_v21, %v2519_v18 }
 0x121   :  { %v1862_v23 = vadd.f32 %v2499_v20, %v1822_v15  ;;  %v2522_v25 = vpop.f32.mrf.mxu1 }
 0x122   :  { %v2501_v26 = vpop.f32.mrf.mxu0 }
 0x123   :  { %v1902_v27 = vadd.f32 %v2521_v24, %v1862_v23  ;;  %v2523_v28 = vpop.f32.mrf.mxu1 }
 0x13c   :  { %v2541_v29 = vpop.f32.mrf.mxu0 }
 0x13d   :  { %v2563_v30 = vpop.f32.mrf.mxu1 }
 0x13e   :  { %v2542_v31 = vpop.f32.mrf.mxu0 }
 0x13f   :  { %v2543_v32 = vadd.f32 %v2542_v31, %v2541_v29  ;;  %v2564_v33 = vpop.f32.mrf.mxu1 }
 0x140   :  { %v2544_v34 = vpop.f32.mrf.mxu0  ;;  %v2565_v37 = vadd.f32 %v2564_v33, %v2563_v30 }
 0x141   :  { %v1942_v36 = vadd.f32 %v2543_v32, %v1902_v27  ;;  %v2566_v38 = vpop.f32.mrf.mxu1 }
 0x142   :  { %v2545_v39 = vpop.f32.mrf.mxu0 }
 0x143   :  { %v1982_v40 = vadd.f32 %v2565_v37, %v1942_v36  ;;  %v2567_v41 = vpop.f32.mrf.mxu1 }
 0x15c   :  { %v2585_v42 = vpop.f32.mrf.mxu0 }
 0x15d   :  { %v2607_v43 = vpop.f32.mrf.mxu1 }
 0x15e   :  { %v2586_v44 = vpop.f32.mrf.mxu0 }
 0x15f   :  { %v2608_v45 = vpop.f32.mrf.mxu1  ;;  %v2587_v58 = vadd.f32 %v2586_v44, %v2585_v42 }
 0x160   :  { %v2588_v46 = vpop.f32.mrf.mxu0  ;;  %v2609_v60 = vadd.f32 %v2608_v45, %v2607_v43 }
 0x161   :  { %v2610_v47 = vpop.f32.mrf.mxu1  ;;  %v2022_v59 = vadd.f32 %v2587_v58, %v1982_v40 }
 0x162   :  { %v2589_v48 = vpop.f32.mrf.mxu0 }
 0x163   :  { %v2611_v49 = vpop.f32.mrf.mxu1  ;;  %v2062_v62 = vadd.f32 %v2609_v60, %v2022_v59 }
 0x17c   :  { %v2629_v50 = vpop.f32.mrf.mxu0 }
 0x17d   :  { %v2651_v51 = vpop.f32.mrf.mxu1 }
 0x17e   :  { %v2630_v52 = vpop.f32.mrf.mxu0 }
 0x17f   :  { %v2652_v53 = vpop.f32.mrf.mxu1  ;;  %v2631_v61 = vadd.f32 %v2630_v52, %v2629_v50 }
 0x180   :  { %v2632_v54 = vpop.f32.mrf.mxu0  ;;  %v2653_v0 = vadd.f32 %v2652_v53, %v2651_v51 }
 0x181   :  { %v2654_v55 = vpop.f32.mrf.mxu1  ;;  %v2102_v63 = vadd.f32 %v2631_v61, %v2062_v62 }
 0x182   :  { %v2633_v56 = vpop.f32.mrf.mxu0 }
 0x183   :  { %v2655_v57 = vpop.f32.mrf.mxu1  ;;  %v2142_v4 = vadd.f32 %v2653_v0, %v2102_v63 }
 0x19c   :  { %v2673_v1 = vpop.f32.mrf.mxu0 }
 0x19d   :  { %v2695_v2 = vpop.f32.mrf.mxu1 }
 0x19e   :  { %v2674_v3 = vpop.f32.mrf.mxu0 }
 0x19f   :  { %v2675_v5 = vadd.f32 %v2674_v3, %v2673_v1  ;;  %v2696_v6 = vpop.f32.mrf.mxu1 }
 0x1a0   :  { %v2676_v7 = vpop.f32.mrf.mxu0  ;;  %v2697_v35 = vadd.f32 %v2696_v6, %v2695_v2 }
 0x1a1   :  { %v2182_v8 = vadd.f32 %v2675_v5, %v2142_v4  ;;  %v2698_v9 = vpop.f32.mrf.mxu1 }
 0x1a2   :  { %v2677_v10 = vpop.f32.mrf.mxu0 }
 0x1a3   :  { %v2222_v11 = vadd.f32 %v2697_v35, %v2182_v8  ;;  %v2699_v12 = vpop.f32.mrf.mxu1 }
 0x1a5   :  { %2227 = vst [vmem:[#allocation7] sm:$0x3] %v2222_v11 }
 0x1a6   :  { %2956 = shalt.err (!%p2953_p0)
}
 0x1a7   :  { %2237 = dma.vmem_to_hbm [thread:$0]  %s2235_s24, 32, %s3026_s3, [#allocation4]  }
 0x1a8   :  { %2969 = dma.done.wait [#allocation4], 32  }
 0x1a9   :  { %2970 = vsyncadd [#allocation4], 4294967264 }
 0x1aa   :  { %2241 = vsyncpa [#allocation3], 1 }
 0x1ab   :  { %2242 = vsyncpa [#allocation6], 1 }
 0x1ac   :  { %2243 = vsyncpa [#allocation4], 1 }

</bundles_post_ra>
